<compile_context>
chip_gen: v6e
topology: v6e:2x2x1
jax: 0.10.0
libtpu: 0.0.40
codegen_flags: <defaults>
</compile_context>

<pallas_src>
import jax
import jax.numpy as jnp
from jax.experimental import pallas as pl
from jax.experimental.pallas import tpu as pltpu


def _round_up(a: int, m: int) -> int:
    return ((a + m - 1) // m) * m


def _svm_kernel(x_ref, w_ref, b_ref, o_ref, acc_ref):
    k = pl.program_id(1)

    @pl.when(k == 0)
    def _init():
        acc_ref[...] = jnp.zeros_like(acc_ref)

    # VPU multiply (the (1, TK) weight row broadcasts over TN sublanes) +
    # XLU reduction over lanes into the f32 accumulator.
    acc_ref[...] += jnp.sum(x_ref[...] * w_ref[...], axis=-1, keepdims=True)

    @pl.when(k == pl.num_programs(1) - 1)
    def _finalize():
        o_ref[...] = (acc_ref[...] + b_ref[0, 0]).astype(o_ref.dtype)


def linear_svm(x, w, b, *, tn_cap=2048, tk_cap=2048,
               vmem_budget_bytes=12 * 1024 * 1024):
    """h = x @ w + b.  x: (N, F) f32, w: (F, 1) f32, b: (1,) f32 -> (N, 1) f32."""
    N, F = x.shape
    x = x.astype(jnp.float32)
    w_row = w.reshape(1, F).astype(jnp.float32)   # lane-dense weight layout
    b2d = b.reshape(1, 1).astype(jnp.float32)

    # Feature (K) tile: whole F if it is small, else 128-aligned K blocks.
    if F <= tk_cap:
        tk = F
    else:
        tk = max(128, (tk_cap // 128) * 128)
    f_pad = _round_up(F, tk)

    # Row (N) tile: multiple of 8, sized so double-buffered x fits the budget.
    tn = (vmem_budget_bytes // (2 * tk * 4)) // 8 * 8
    tn = max(8, min(tn_cap, tn))
    tn = min(tn, _round_up(N, 8))
    n_pad = _round_up(N, tn)

    # Zero-pad tail tiles (zero rows/cols contribute nothing to the dot).
    if n_pad != N or f_pad != F:
        x_p = jnp.zeros((n_pad, f_pad), jnp.float32).at[:N, :F].set(x)
    else:
        x_p = x
    if f_pad != F:
        w_p = jnp.zeros((1, f_pad), jnp.float32).at[:, :F].set(w_row)
    else:
        w_p = w_row

    grid = (n_pad // tn, f_pad // tk)

    out = pl.pallas_call(
        _svm_kernel,
        out_shape=jax.ShapeDtypeStruct((n_pad, 1), jnp.float32),
        grid_spec=pltpu.PrefetchScalarGridSpec(
            num_scalar_prefetch=0,
            grid=grid,
            in_specs=[
                pl.BlockSpec((tn, tk), lambda i, k: (i, k)),        # x tile
                pl.BlockSpec((1, tk), lambda i, k: (0, k)),         # w row tile
                pl.BlockSpec(memory_space=pltpu.MemorySpace.SMEM),  # bias scalar
            ],
            out_specs=pl.BlockSpec((tn, 1), lambda i, k: (i, 0)),
            scratch_shapes=[pltpu.VMEM((tn, 1), jnp.float32)],
        ),
        compiler_params=pltpu.CompilerParams(
            dimension_semantics=("parallel", "arbitrary"),
            vmem_limit_bytes=32 * 1024 * 1024,
        ),
        cost_estimate=pl.CostEstimate(
            flops=2 * N * F,
            bytes_accessed=4 * (N * F + F + N + 1),
            transcendentals=0,
        ),
    )(x_p, w_p, b2d)

    return out[:N] if n_pad != N else out


if __name__ == "__main__":
    key = jax.random.PRNGKey(0)
    k_x, k_w, k_b = jax.random.split(key, 3)

    # Shapes consistent with LinearSVM(in_feature=32) on a small batch.
    N, in_feature = 8, 32
    x = jax.random.uniform(k_x, (N, in_feature), dtype=jnp.float32)
    w = jax.random.uniform(k_w, (in_feature, 1), dtype=jnp.float32)
    b = jax.random.uniform(k_b, (1,), dtype=jnp.float32)

    out = jax.block_until_ready(linear_svm(x, w, b))
    ref = x @ w + b
    assert out.shape == (N, 1)
    assert jnp.allclose(out, ref, atol=1e-4, rtol=1e-5), "small-shape mismatch"

    # Exercise the tiled / padded path (multiple N and K grid steps).
    k_x2, k_w2, k_b2 = jax.random.split(jax.random.PRNGKey(1), 3)
    N2, F2 = 300, 160
    x2 = jax.random.uniform(k_x2, (N2, F2), dtype=jnp.float32)
    w2 = jax.random.uniform(k_w2, (F2, 1), dtype=jnp.float32)
    b2 = jax.random.uniform(k_b2, (1,), dtype=jnp.float32)
    out2 = jax.block_until_ready(linear_svm(x2, w2, b2, tn_cap=128, tk_cap=128))
    ref2 = x2 @ w2 + b2
    assert out2.shape == (N2, 1)
    assert jnp.allclose(out2, ref2, atol=1e-4, rtol=1e-5), "tiled-path mismatch"

    print("KERNEL_OK")
</pallas_src>

<mosaic_0001>
module attributes {stable_mosaic.version = 11 : i64} {
  func.func @_svm_kernel(%arg0: i32, %arg1: i32, %arg2: memref<8x32xf32, #tpu.memory_space<vmem>>, %arg3: memref<1x32xf32, #tpu.memory_space<vmem>>, %arg4: memref<1x1xf32, #tpu.memory_space<smem>>, %arg5: memref<8x1xf32, #tpu.memory_space<vmem>>, %arg6: memref<8x1xf32, #tpu.memory_space<vmem>>) attributes {dimension_semantics = [#tpu.dimension_semantics<parallel>, #tpu.dimension_semantics<arbitrary>], iteration_bounds = array<i64: 1, 1>, scalar_prefetch = 0 : i64, scratch_operands = 1 : i64, tpu.core_type = #tpu.core_type<tc>, window_params = [{transform_indices = @transform_0, window_bounds = array<i64: 8, 32>}, {transform_indices = @transform_1, window_bounds = array<i64: 1, 32>}, {transform_indices = @transform_2, window_bounds = array<i64: 1, 1>}, {transform_indices = @transform_3, window_bounds = array<i64: 8, 1>}]} {
    %c0_i32 = arith.constant 0 : i32
    %0 = arith.cmpi eq, %arg1, %c0_i32 : i32
    %1 = arith.extui %0 : i1 to i32
    %c0_i32_0 = arith.constant 0 : i32
    %2 = arith.cmpi ne, %1, %c0_i32_0 : i32
    scf.if %2 {
      %cst_10 = arith.constant 0.000000e+00 : f32
      %15 = vector.broadcast %cst_10 : f32 to vector<8x1xf32>
      %c0_11 = arith.constant 0 : index
      %c0_12 = arith.constant 0 : index
      %16 = vector.load %arg6[%c0_11, %c0_12] : memref<8x1xf32, #tpu.memory_space<vmem>>, vector<8x1xf32>
      tpu.vector_store %arg6[%c0_11, %c0_12], %15 {strides = array<i32>} : memref<8x1xf32, #tpu.memory_space<vmem>>, vector<8x1xf32>,
    } else {
    }
    %c0 = arith.constant 0 : index
    %c0_1 = arith.constant 0 : index
    %3 = vector.load %arg6[%c0, %c0_1] : memref<8x1xf32, #tpu.memory_space<vmem>>, vector<8x1xf32>
    %c0_2 = arith.constant 0 : index
    %c0_3 = arith.constant 0 : index
    %4 = vector.load %arg2[%c0_2, %c0_3] : memref<8x32xf32, #tpu.memory_space<vmem>>, vector<8x32xf32>
    %c0_4 = arith.constant 0 : index
    %c0_5 = arith.constant 0 : index
    %5 = vector.load %arg3[%c0_4, %c0_5] : memref<1x32xf32, #tpu.memory_space<vmem>>, vector<1x32xf32>
    %6 = vector.broadcast %5 : vector<1x32xf32> to vector<8x32xf32>
    %7 = arith.mulf %4, %6 : vector<8x32xf32>
    %cst = arith.constant dense<0.000000e+00> : vector<8xf32>
    %8 = vector.multi_reduction <add>, %7, %cst [1] : vector<8x32xf32> to vector<8xf32>
    %9 = vector.shape_cast %8 : vector<8xf32> to vector<8x1xf32>
    %10 = arith.addf %3, %9 : vector<8x1xf32>
    %c0_6 = arith.constant 0 : index
    %c0_7 = arith.constant 0 : index
    %11 = vector.load %arg6[%c0_6, %c0_7] : memref<8x1xf32, #tpu.memory_space<vmem>>, vector<8x1xf32>
    tpu.vector_store %arg6[%c0_6, %c0_7], %10 {strides = array<i32>} : memref<8x1xf32, #tpu.memory_space<vmem>>, vector<8x1xf32>,
    %c0_i32_8 = arith.constant 0 : i32
    %12 = arith.cmpi eq, %arg1, %c0_i32_8 : i32
    %13 = arith.extui %12 : i1 to i32
    %c0_i32_9 = arith.constant 0 : i32
    %14 = arith.cmpi ne, %13, %c0_i32_9 : i32
    scf.if %14 {
      %c0_10 = arith.constant 0 : index
      %c0_11 = arith.constant 0 : index
      %15 = vector.load %arg6[%c0_10, %c0_11] : memref<8x1xf32, #tpu.memory_space<vmem>>, vector<8x1xf32>
      %c0_12 = arith.constant 0 : index
      %c0_13 = arith.constant 0 : index
      %16 = memref.load %arg4[%c0_12, %c0_13] : memref<1x1xf32, #tpu.memory_space<smem>>
      %17 = vector.broadcast %16 : f32 to vector<8x1xf32>
      %18 = arith.addf %15, %17 : vector<8x1xf32>
      %c0_14 = arith.constant 0 : index
      %c0_15 = arith.constant 0 : index
      %19 = vector.load %arg5[%c0_14, %c0_15] : memref<8x1xf32, #tpu.memory_space<vmem>>, vector<8x1xf32>
      tpu.vector_store %arg5[%c0_14, %c0_15], %18 {strides = array<i32>} : memref<8x1xf32, #tpu.memory_space<vmem>>, vector<8x1xf32>,
    } else {
    }
    return
  }
  func.func @transform_0(%arg0: i32, %arg1: i32) -> (i32, i32) {
    %c0_i32 = arith.constant 0 : i32
    return %arg0, %arg1 : i32, i32
  }
  func.func @transform_1(%arg0: i32, %arg1: i32) -> (i32, i32) {
    %c0_i32 = arith.constant 0 : i32
    %c0_i32_0 = arith.constant 0 : i32
    return %c0_i32, %arg1 : i32, i32
  }
  func.func @transform_2(%arg0: i32, %arg1: i32) -> (i32, i32) {
    %c0_i32 = arith.constant 0 : i32
    %c0_i32_0 = arith.constant 0 : i32
    %c0_i32_1 = arith.constant 0 : i32
    return %c0_i32, %c0_i32_0 : i32, i32
  }
  func.func @transform_3(%arg0: i32, %arg1: i32) -> (i32, i32) {
    %c0_i32 = arith.constant 0 : i32
    %c0_i32_0 = arith.constant 0 : i32
    return %arg0, %c0_i32 : i32, i32
  }
}

</mosaic_0001>

<bundles_post_ra>
// kernel: tpu_custom_call.1
= control target key start
LH: loop header
LB: loop body
LE: loop exit
PB: predicated region body
PF: predicated region fallthrough
CT: control target
= control target key end

     0   :  { %9 = vsyncpa [#allocation5], 0  ;;  %s88_s12 = smov [#allocation4]   ;;  %s125_s0 = inlined_call_operand.hbm [shape: f32[8,32], index: 0, kind: input, shape index: {}]   ;;  %s126_s1 = inlined_call_operand.vmem [shape: f32[1,32], index: 1, kind: input, shape index: {}]   ;;  %s127_s2 = inlined_call_operand.<no memory space> [shape: f32[1,1], index: 2, kind: input, shape index: {}]   ;;  %s128_s3 = inlined_call_operand.vmem [shape: f32[8,1], index: 3, kind: output, shape index: {}]  }
   0x1   :  { %s16_s13 = sshll.u32 %s88_s12, 4  ;;  %s17_s13 = int_to_ptr.vmem [resolvable:$true] %s16_s13 }
   0x2   :  { %s74_s14 = scalar_lea.vmem %s17_s13, 128  ;;  %p79_p1 = scmp.lt.s32.totalorder %s17_s13, %s17_s13 }
   0x3   :  { %p75_p0 = scmp.ne.s32.totalorder %s17_s13, %s74_s14  ;;  %p80_p2 = scmp.lt.s32.totalorder %s74_s14, %s74_s14 }
   0x5   :  { %p81_p3 = por %p80_p2, %p79_p1 }
   0x7   :  { %p82_p4 = pnand %p81_p3, %p75_p0 }
   0x9   :  { %85 = shalt.err (!%p82_p4)
}
   0xa   :  { %19 = dma.hbm_to_vmem [thread:$0]  %s125_s0, 128, %s17_s13, [#allocation5]  }
   0xb   :  { %86 = dma.done.wait [#allocation5], 128  }
   0xc   :  { %87 = vsyncadd [#allocation5], 4294967168  ;;  %vm31_vm0 = vcmask 7168   ;;  %v89_v0 = vmov 0.0   ;;  %v34_v1 = vld [vmem:[#allocation4] sm:$0xff]  ;;  %vm43_vm1 = vcmask 261120   ;;  %v55_v8 = vstv %s127_s2 }
   0xd   :  { %32 = vst.msk [vmem:[#allocation2] sm:$0xff] %vm31_vm0, %v89_v0  ;;  %v63_v2 = vld [vmem:[%s126_s1] ss:$0 sm:$0xff] }
   0xe   :  { %v42_v3 = vmul.f32 %v63_v2, %v34_v1 }
  0x10   :  { %v44_v4 = vsel %vm43_vm1, %v42_v3, 0.0 }
  0x11   :  { %45 = vadd.xlane.f32.xlu0 %v44_v4 }
  0x14   :  { %v33_v5 = vld [vmem:[#allocation2] sm:$0xff] }
  0x9a   :  { %v46_v6 = vpop.xlane.xlu0 %45 }
  0x9b   :  { %v47_v7 = vadd.f32 %v46_v6, %v33_v5 }
  0x9d   :  { %49 = vst.msk [vmem:[#allocation2] sm:$0xff] %vm31_vm0, %v47_v7 }
  0xa4   :  { %v53_v9 = vld [vmem:[#allocation2] sm:$0xff] }
  0xa5   :  { %v56_v10 = vadd.f32 %v55_v8, %v53_v9 }
  0xa7   :  { %57 = vst.msk [vmem:[%s128_s3] sm:$0xff] %vm31_vm0, %v56_v10 }
  0xa8   :  { %62 = vsyncpa [#allocation5], 1 }

</bundles_post_ra>
